<compile_context>
chip_gen: v6e
topology: v6e:2x2x1
jax: 0.10.0
libtpu: 0.0.40
codegen_flags: <defaults>
</compile_context>

<pallas_src>
import jax
import jax.numpy as jnp
from jax.experimental import pallas as pl
from jax.experimental.pallas import tpu as pltpu


# ----------------------------------------------------------------------------
# Kernel
# ----------------------------------------------------------------------------
def _server_kernel(*refs):
    """refs = (in_ref_0, ..., in_ref_{C-1}, o_ref); each a (TB, TF) VMEM tile."""
    *in_refs, o_ref = refs
    # Static Python loop over the (small) client count; keeps live ranges at
    # ~2 tiles and never materializes a stacked (C, TB, TF) slab.
    acc = in_refs[0][...].astype(jnp.float32)
    for r in in_refs[1:]:
        acc = acc + r[...].astype(jnp.float32)
    o_ref[...] = jnp.maximum(acc, 0.0).astype(o_ref.dtype)  # ReLU


# ----------------------------------------------------------------------------
# Tiling
# ----------------------------------------------------------------------------
# Conservative per-step VMEM footprint (double-buffered inputs + output) that
# fits comfortably on v5e/v6e (128 MiB) and v7x (64 MiB) physical VMEM.
_VMEM_TILE_BUDGET_BYTES = 24 * 1024 * 1024
_VMEM_LIMIT_BYTES = 48 * 1024 * 1024
_MAX_TF = 2048   # lane-dense feature tile cap (multiple of 128)
_MAX_TB = 512    # batch tile cap (multiple of 8)


def _tile_sizes(b, f, n_buffers, itemsize):
    """Pick (tb, tf): lane-dense, VMEM-budgeted, ragged tails allowed."""
    # Feature (lane) tile: full extent if small, else a multiple of 128.
    tf = f if f <= _MAX_TF else _MAX_TF
    # Batch (sublane) tile: sized so 2 * n_buffers tiles fit the VMEM budget.
    bytes_per_row = 2 * n_buffers * tf * itemsize
    max_tb = _VMEM_TILE_BUDGET_BYTES // max(bytes_per_row, 1)
    max_tb = min(_MAX_TB, max(8, (max_tb // 8) * 8))
    tb = b if b <= max_tb else max_tb
    return tb, tf


# ----------------------------------------------------------------------------
# Wrapper
# ----------------------------------------------------------------------------
@jax.jit
def server_forward(*client_outputs):
    """relu(sum(client_outputs)); each client output is a (B, F) array."""
    c = len(client_outputs)
    assert c >= 1
    b, f = client_outputs[0].shape
    dtype = client_outputs[0].dtype
    itemsize = jnp.dtype(dtype).itemsize

    tb, tf = _tile_sizes(b, f, c + 1, itemsize)
    grid = (pl.cdiv(b, tb), pl.cdiv(f, tf))
    tile_spec = pl.BlockSpec((tb, tf), lambda i, j: (i, j))

    return pl.pallas_call(
        _server_kernel,
        out_shape=jax.ShapeDtypeStruct((b, f), dtype),
        grid_spec=pltpu.PrefetchScalarGridSpec(
            num_scalar_prefetch=0,
            grid=grid,
            in_specs=[tile_spec] * c,
            out_specs=tile_spec,
        ),
        compiler_params=pltpu.CompilerParams(
            dimension_semantics=("parallel", "parallel"),
            vmem_limit_bytes=_VMEM_LIMIT_BYTES,
        ),
    )(*client_outputs)


def init_server_params(input_dim, hidden_dim, key):
    """Deterministic init of the (unused-in-forward) aggregation_layer params."""
    kw, kb = jax.random.split(key)
    bound = 1.0 / jnp.sqrt(input_dim)
    weight = jax.random.uniform(kw, (hidden_dim, input_dim), jnp.float32, -bound, bound)
    bias = jax.random.uniform(kb, (hidden_dim,), jnp.float32, -bound, bound)
    return {"aggregation_layer.weight": weight, "aggregation_layer.bias": bias}


if __name__ == "__main__":
    key = jax.random.PRNGKey(0)

    num_clients = 2          # 2-party VFL
    batch = 8
    feat = 128               # per-client output feature dim (== input_dim of server)
    hidden_dim = 32

    # Parameters of the (unused) aggregation layer — mirrors nn.Linear(input_dim, hidden_dim).
    params = init_server_params(feat, hidden_dim, key)

    # Deterministic example client outputs (kept as separate arrays; no stacking).
    keys = jax.random.split(key, num_clients + 1)
    client_outputs = [
        jax.random.normal(keys[i + 1], (batch, feat), dtype=jnp.float32)
        for i in range(num_clients)
    ]

    out = server_forward(*client_outputs)
    out = jax.block_until_ready(out)

    # Reference check against plain JAX.
    ref = jnp.maximum(sum(client_outputs), 0.0)
    assert out.shape == (batch, feat)
    assert jnp.allclose(out, ref, atol=1e-6), "mismatch vs reference"

    print("KERNEL_OK")
</pallas_src>

<mosaic_0001>
module attributes {stable_mosaic.version = 11 : i64} {
  func.func @_server_kernel(%arg0: i32, %arg1: i32, %arg2: memref<8x128xf32, #tpu.memory_space<vmem>>, %arg3: memref<8x128xf32, #tpu.memory_space<vmem>>, %arg4: memref<8x128xf32, #tpu.memory_space<vmem>>) attributes {dimension_semantics = [#tpu.dimension_semantics<parallel>, #tpu.dimension_semantics<parallel>], iteration_bounds = array<i64: 1, 1>, scalar_prefetch = 0 : i64, scratch_operands = 0 : i64, tpu.core_type = #tpu.core_type<tc>, window_params = [{transform_indices = @transform_0, window_bounds = array<i64: 8, 128>}, {transform_indices = @transform_1, window_bounds = array<i64: 8, 128>}, {transform_indices = @transform_2, window_bounds = array<i64: 8, 128>}]} {
    %c0 = arith.constant 0 : index
    %c0_0 = arith.constant 0 : index
    %0 = vector.load %arg2[%c0, %c0_0] : memref<8x128xf32, #tpu.memory_space<vmem>>, vector<8x128xf32>
    %c0_1 = arith.constant 0 : index
    %c0_2 = arith.constant 0 : index
    %1 = vector.load %arg3[%c0_1, %c0_2] : memref<8x128xf32, #tpu.memory_space<vmem>>, vector<8x128xf32>
    %2 = arith.addf %0, %1 : vector<8x128xf32>
    %cst = arith.constant 0.000000e+00 : f32
    %3 = vector.broadcast %cst : f32 to vector<8x128xf32>
    %4 = arith.maximumf %2, %3 : vector<8x128xf32>
    %c0_3 = arith.constant 0 : index
    %c0_4 = arith.constant 0 : index
    %5 = vector.load %arg4[%c0_3, %c0_4] : memref<8x128xf32, #tpu.memory_space<vmem>>, vector<8x128xf32>
    tpu.vector_store %arg4[%c0_3, %c0_4], %4 {strides = array<i32>} : memref<8x128xf32, #tpu.memory_space<vmem>>, vector<8x128xf32>,
    return
  }
  func.func @transform_0(%arg0: i32, %arg1: i32) -> (i32, i32) {
    %c0_i32 = arith.constant 0 : i32
    return %arg0, %arg1 : i32, i32
  }
  func.func @transform_1(%arg0: i32, %arg1: i32) -> (i32, i32) {
    %c0_i32 = arith.constant 0 : i32
    return %arg0, %arg1 : i32, i32
  }
  func.func @transform_2(%arg0: i32, %arg1: i32) -> (i32, i32) {
    %c0_i32 = arith.constant 0 : i32
    return %arg0, %arg1 : i32, i32
  }
}

</mosaic_0001>

<bundles_post_ra>
// kernel: server_forward.1
= control target key start
LH: loop header
LB: loop body
LE: loop exit
PB: predicated region body
PF: predicated region fallthrough
CT: control target
= control target key end

     0   :  { %7 = vsyncpa [#allocation3], 0  ;;  %s153_s0 = inlined_call_operand.hbm [shape: f32[8,128], index: 0, kind: input, shape index: {}]   ;;  %s154_s1 = inlined_call_operand.hbm [shape: f32[8,128], index: 1, kind: input, shape index: {}]   ;;  %s155_s2 = inlined_call_operand.hbm [shape: f32[8,128], index: 2, kind: output, shape index: {}]  }
   0x1   :  { %8 = vsyncpa [#allocation6], 0 }
   0x2   :  { %9 = vsyncpa [#allocation4], 0  ;;  %s126_s9 = smov [#allocation2]   ;;  %s127_s11 = smov [#allocation5]  }
   0x3   :  { %s16_s10 = sshll.u32 %s126_s9, 4  ;;  %s26_s12 = sshll.u32 %s127_s11, 4  ;;  %s17_s10 = int_to_ptr.vmem [resolvable:$true] %s16_s10  ;;  %s27_s12 = int_to_ptr.vmem [resolvable:$true] %s26_s12 }
   0x4   :  { %s68_s13 = scalar_lea.vmem %s17_s10, 128  ;;  %p73_p1 = scmp.lt.s32.totalorder %s17_s10, %s17_s10 }
   0x5   :  { %p69_p0 = scmp.ne.s32.totalorder %s17_s10, %s68_s13  ;;  %p74_p2 = scmp.lt.s32.totalorder %s68_s13, %s68_s13 }
   0x7   :  { %p75_p3 = por %p74_p2, %p73_p1 }
   0x9   :  { %p76_p4 = pnand %p75_p3, %p69_p0 }
   0xb   :  { %79 = shalt.err (!%p76_p4)
}
   0xc   :  { %19 = dma.hbm_to_vmem [thread:$0]  %s153_s0, 128, %s17_s10, [#allocation3]  }
   0xd   :  { %s88_s16 = scalar_lea.vmem %s27_s12, 128  ;;  %p93_p6 = scmp.lt.s32.totalorder %s27_s12, %s27_s12 }
   0xe   :  { %p89_p5 = scmp.ne.s32.totalorder %s27_s12, %s88_s16  ;;  %p94_p7 = scmp.lt.s32.totalorder %s88_s16, %s88_s16 }
  0x10   :  { %p95_p8 = por %p94_p7, %p93_p6 }
  0x12   :  { %p96_p9 = pnand %p95_p8, %p89_p5 }
  0x14   :  { %99 = shalt.err (!%p96_p9)
}
  0x15   :  { %29 = dma.hbm_to_vmem [thread:$0]  %s154_s1, 128, %s27_s12, [#allocation6]  }
  0x16   :  { %120 = dma.done.wait [#allocation3], 128  }
  0x17   :  { %121 = vsyncadd [#allocation3], 4294967168 }
  0x18   :  { %122 = dma.done.wait [#allocation6], 128  }
  0x19   :  { %123 = vsyncadd [#allocation6], 4294967168  ;;  %v36_v0 = vld [vmem:[#allocation2] sm:$0xff]  ;;  %v37_v1 = vld [vmem:[#allocation5] sm:$0xff]  ;;  %s128_s19 = smov [#allocation7]  }
  0x1a   :  { %s47_s20 = sshll.u32 %s128_s19, 4  ;;  %v38_v2 = vadd.f32 %v37_v1, %v36_v0  ;;  %s48_s20 = int_to_ptr.vmem [resolvable:$true] %s47_s20 }
  0x1b   :  { %s100_s0 = scalar_lea.vmem %s48_s20, 128  ;;  %p105_p11 = scmp.lt.s32.totalorder %s48_s20, %s48_s20 }
  0x1c   :  { %v39_v3 = vmax.f32 %v38_v2, 0.0  ;;  %p101_p10 = scmp.ne.s32.totalorder %s48_s20, %s100_s0  ;;  %p106_p12 = scmp.lt.s32.totalorder %s100_s0, %s100_s0 }
  0x1e   :  { %40 = vst [vmem:[#allocation7] sm:$0xff] %v39_v3  ;;  %p107_p13 = por %p106_p12, %p105_p11 }
  0x20   :  { %p108_p0 = pnand %p107_p13, %p101_p10 }
  0x22   :  { %111 = shalt.err (!%p108_p0)
}
  0x23   :  { %50 = dma.vmem_to_hbm [thread:$0]  %s48_s20, 128, %s155_s2, [#allocation4]  }
  0x24   :  { %124 = dma.done.wait [#allocation4], 128  }
  0x25   :  { %125 = vsyncadd [#allocation4], 4294967168 }
  0x26   :  { %54 = vsyncpa [#allocation3], 1 }
  0x27   :  { %55 = vsyncpa [#allocation6], 1 }
  0x28   :  { %56 = vsyncpa [#allocation4], 1 }

</bundles_post_ra>
